<compile_context>
chip_gen: v7x
topology: tpu7x:2x2x1
jax: 0.10.0
libtpu: 0.0.40
codegen_flags: <defaults>
</compile_context>

<pallas_src>
import functools

import jax
import jax.numpy as jnp
from jax import lax
from jax.experimental import pallas as pl
from jax.experimental.pallas import tpu as pltpu


def make_divisible(v, divisor=8, min_value=None, round_limit=0.9):
    min_value = min_value or divisor
    new_v = max(min_value, int(v + divisor / 2) // divisor * divisor)
    if new_v < round_limit * v:
        new_v += divisor
    return new_v


def _round_up(x, m):
    return (x + m - 1) // m * m


def _channel_attn_kernel(x_ref, w1t_ref, w2t_ref, o_ref, *, hw_true, needs_mask):
    # x_ref / o_ref: (Bt, C, HWp) f32
    # w1t_ref: (C, Crd)   (fc1 weight, transposed)
    # w2t_ref: (Crd, C)   (fc2 weight, transposed)
    x = x_ref[...]
    bt = x.shape[0]

    # ---- spatial pooling over the lane axis (pad excluded) ----
    x_sum = jnp.sum(x, axis=2)                     # (Bt, C)
    x_avg = x_sum * (1.0 / hw_true)                # mean uses true HW
    if needs_mask:
        col = lax.broadcasted_iota(jnp.int32, x.shape, 2)
        x_for_max = jnp.where(col < hw_true, x, -jnp.inf)
    else:
        x_for_max = x
    x_max = jnp.max(x_for_max, axis=2)             # (Bt, C)

    # ---- fused MLP: one fc1 and one fc2 over 2*Bt pooled vectors ----
    pooled = jnp.concatenate([x_avg, x_max], axis=0)            # (2*Bt, C)
    h = jnp.maximum(
        jnp.dot(pooled, w1t_ref[...], preferred_element_type=jnp.float32),
        0.0)                                                    # (2*Bt, Crd)
    attn2 = jnp.dot(h, w2t_ref[...],
                    preferred_element_type=jnp.float32)         # (2*Bt, C)
    attn = attn2[:bt] + attn2[bt:]                              # (Bt, C)
    gate = jax.nn.sigmoid(attn)                                 # (Bt, C)

    # ---- broadcast-scale the full plane, lane-dense store ----
    o_ref[...] = x * gate[:, :, None]


def channel_attn(x_nchw, w1, w2, *, vmem_block_budget=24 << 20):
    """x_nchw: (B, C, H, W) f32; w1: (Crd, C) fc1 weight; w2: (C, Crd) fc2 weight."""
    B, C, H, W = x_nchw.shape
    HW = H * W
    HWp = _round_up(HW, 128)
    Crd = w1.shape[0]

    x_flat = x_nchw.reshape(B, C, HW).astype(jnp.float32)
    if HWp != HW:
        x_flat = jnp.pad(x_flat, ((0, 0), (0, 0), (0, HWp - HW)))

    # Pre-transpose weights so the kernel runs plain (rows, C) @ (C, Crd) matmuls.
    w1t = jnp.asarray(w1, jnp.float32).T   # (C, Crd)
    w2t = jnp.asarray(w2, jnp.float32).T   # (Crd, C)

    # Largest batch tile (divisor of B) whose double-buffered in+out fits budget.
    per_batch_bytes = C * HWp * 4
    Bt = 1
    for bt in range(1, B + 1):
        if B % bt == 0 and 4 * bt * per_batch_bytes <= vmem_block_budget:
            Bt = bt
    # TODO(synk): for very large planes (4*C*HW*4 approaching the v7x 64 MiB VMEM),
    # switch to a two-pass pool/scale kernel tiled over HW instead of keeping the
    # whole (C, HW) plane resident.

    block_bytes = Bt * per_batch_bytes
    w_bytes = 2 * C * Crd * 4
    vmem_limit = int(min(
        max(8 << 20, 4 * block_bytes + 4 * w_bytes + (2 << 20)),
        100 << 20))

    kernel = functools.partial(
        _channel_attn_kernel, hw_true=HW, needs_mask=(HWp != HW))

    out = pl.pallas_call(
        kernel,
        out_shape=jax.ShapeDtypeStruct((B, C, HWp), jnp.float32),
        grid_spec=pltpu.PrefetchScalarGridSpec(
            num_scalar_prefetch=0,
            grid=(B // Bt,),
            in_specs=[
                pl.BlockSpec((Bt, C, HWp), lambda b: (b, 0, 0)),
                pl.BlockSpec((C, Crd), lambda b: (0, 0)),
                pl.BlockSpec((Crd, C), lambda b: (0, 0)),
            ],
            out_specs=pl.BlockSpec((Bt, C, HWp), lambda b: (b, 0, 0)),
        ),
        compiler_params=pltpu.CompilerParams(
            dimension_semantics=("parallel",),
            vmem_limit_bytes=vmem_limit),
    )(x_flat, w1t, w2t)

    if HWp != HW:
        out = out[:, :, :HW]
    return out.reshape(B, C, H, W)


def channel_attn_ref(x, w1, w2):
    # pure-JAX reference of the PyTorch forward
    x_avg = jnp.mean(x, axis=(2, 3), keepdims=True)   # (B, C, 1, 1)
    x_max = jnp.max(x, axis=(2, 3), keepdims=True)    # (B, C, 1, 1)

    def mlp(v):  # v: (B, C, 1, 1)
        vv = v[:, :, 0, 0]                                  # (B, C)
        h = jnp.maximum(vv @ w1.T, 0.0)                     # (B, Crd)
        return (h @ w2.T)[:, :, None, None]                 # (B, C, 1, 1)

    gate = jax.nn.sigmoid(mlp(x_avg) + mlp(x_max))
    return x * gate


def _make_case(key, B, C, H, W):
    rd_channels = make_divisible(C * (1.0 / 16), divisor=1, round_limit=0.0)
    kx, k1, k2 = jax.random.split(key, 3)
    x = jax.random.normal(kx, (B, C, H, W), dtype=jnp.float32)
    # fc1: Conv2d(C, rd, 1, bias=False) -> weight (rd, C, 1, 1) collapsed to (rd, C)
    w1 = (jax.random.normal(k1, (rd_channels, C), dtype=jnp.float32)
          * (1.0 / jnp.sqrt(C)))
    # fc2: Conv2d(rd, C, 1, bias=False) -> weight (C, rd, 1, 1) collapsed to (C, rd)
    w2 = (jax.random.normal(k2, (C, rd_channels), dtype=jnp.float32)
          * (1.0 / jnp.sqrt(rd_channels)))
    return x, w1, w2


if __name__ == "__main__":
    key = jax.random.PRNGKey(0)
    k_a, k_b = jax.random.split(key)

    # Case 1: 128-aligned spatial size (no pad path).
    x, w1, w2 = _make_case(k_a, B=2, C=32, H=16, W=16)
    out = jax.block_until_ready(channel_attn(x, w1, w2))
    ref = channel_attn_ref(x, w1, w2)
    assert out.shape == x.shape
    assert jnp.allclose(out, ref, atol=1e-5, rtol=1e-5), "mismatch (aligned case)"

    # Case 2: non-128-aligned spatial size exercises the pad + masked-max path.
    x2, w12, w22 = _make_case(k_b, B=2, C=16, H=7, W=7)
    out2 = jax.block_until_ready(channel_attn(x2, w12, w22))
    ref2 = channel_attn_ref(x2, w12, w22)
    assert out2.shape == x2.shape
    assert jnp.allclose(out2, ref2, atol=1e-5, rtol=1e-5), "mismatch (padded case)"

    print("KERNEL_OK")
</pallas_src>

<mosaic_0001>
module attributes {stable_mosaic.version = 11 : i64} {
  func.func @_channel_attn_kernel(%arg0: i32, %arg1: memref<2x32x256xf32, #tpu.memory_space<vmem>>, %arg2: memref<32x2xf32, #tpu.memory_space<vmem>>, %arg3: memref<2x32xf32, #tpu.memory_space<vmem>>, %arg4: memref<2x32x256xf32, #tpu.memory_space<vmem>>) attributes {dimension_semantics = [#tpu.dimension_semantics<parallel>], iteration_bounds = array<i64: 1>, scalar_prefetch = 0 : i64, scratch_operands = 0 : i64, tpu.core_type = #tpu.core_type<tc>, window_params = [{transform_indices = @transform_0, window_bounds = array<i64: 2, 32, 256>}, {pipeline_mode = #tpu.pipeline_mode<synchronous>, transform_indices = @transform_1, window_bounds = array<i64: 32, 2>}, {pipeline_mode = #tpu.pipeline_mode<synchronous>, transform_indices = @transform_2, window_bounds = array<i64: 2, 32>}, {transform_indices = @transform_3, window_bounds = array<i64: 2, 32, 256>}]} {
    %c0 = arith.constant 0 : index
    %c0_0 = arith.constant 0 : index
    %c0_1 = arith.constant 0 : index
    %0 = vector.load %arg1[%c0, %c0_0, %c0_1] : memref<2x32x256xf32, #tpu.memory_space<vmem>>, vector<2x32x256xf32>
    %cst = arith.constant dense<0.000000e+00> : vector<2x32xf32>
    %1 = vector.multi_reduction <add>, %0, %cst [2] : vector<2x32x256xf32> to vector<2x32xf32>
    %cst_2 = arith.constant 3.906250e-03 : f32
    %2 = vector.broadcast %cst_2 : f32 to vector<2x32xf32>
    %3 = arith.mulf %1, %2 : vector<2x32xf32>
    %cst_3 = arith.constant dense<0xFF800000> : vector<2x32xf32>
    %4 = vector.multi_reduction <maximumf>, %0, %cst_3 [2] : vector<2x32x256xf32> to vector<2x32xf32>
    %5 = tpu.concatenate %3, %4 in 0 : vector<2x32xf32>, vector<2x32xf32> -> vector<4x32xf32>
    %c0_4 = arith.constant 0 : index
    %c0_5 = arith.constant 0 : index
    %6 = vector.load %arg2[%c0_4, %c0_5] : memref<32x2xf32, #tpu.memory_space<vmem>>, vector<32x2xf32>
    %cst_6 = arith.constant dense<0.000000e+00> : vector<4x2xf32>
    %7 = tpu.matmul %5, %6, %cst_6 {dimension_numbers = #tpu.dot_dimension_numbers<[1], [0], [0], [1], [0, 0, 1, 1], [], []>} : vector<4x32xf32>, vector<32x2xf32>, vector<4x2xf32> -> vector<4x2xf32>
    %cst_7 = arith.constant 0.000000e+00 : f32
    %8 = vector.broadcast %cst_7 : f32 to vector<4x2xf32>
    %9 = arith.maximumf %7, %8 : vector<4x2xf32>
    %c0_8 = arith.constant 0 : index
    %c0_9 = arith.constant 0 : index
    %10 = vector.load %arg3[%c0_8, %c0_9] : memref<2x32xf32, #tpu.memory_space<vmem>>, vector<2x32xf32>
    %cst_10 = arith.constant dense<0.000000e+00> : vector<4x32xf32>
    %11 = tpu.matmul %9, %10, %cst_10 {dimension_numbers = #tpu.dot_dimension_numbers<[1], [0], [0], [1], [0, 0, 1, 1], [], []>} : vector<4x2xf32>, vector<2x32xf32>, vector<4x32xf32> -> vector<4x32xf32>
    %12 = vector.extract_strided_slice %11 {offsets = [0, 0], sizes = [2, 32], strides = [1, 1]} : vector<4x32xf32> to vector<2x32xf32>
    %13 = vector.extract_strided_slice %11 {offsets = [2, 0], sizes = [2, 32], strides = [1, 1]} : vector<4x32xf32> to vector<2x32xf32>
    %14 = arith.addf %12, %13 : vector<2x32xf32>
    %15 = arith.negf %14 : vector<2x32xf32>
    %16 = math.exp %15 : vector<2x32xf32>
    %cst_11 = arith.constant 1.000000e+00 : f32
    %17 = vector.broadcast %cst_11 : f32 to vector<2x32xf32>
    %18 = arith.addf %17, %16 : vector<2x32xf32>
    %19 = arith.divf %17, %18 : vector<2x32xf32>
    %20 = vector.shape_cast %19 : vector<2x32xf32> to vector<2x32x1xf32>
    %21 = vector.broadcast %20 : vector<2x32x1xf32> to vector<2x32x256xf32>
    %22 = arith.mulf %0, %21 : vector<2x32x256xf32>
    %c0_12 = arith.constant 0 : index
    %c0_13 = arith.constant 0 : index
    %c0_14 = arith.constant 0 : index
    %23 = vector.load %arg4[%c0_12, %c0_13, %c0_14] : memref<2x32x256xf32, #tpu.memory_space<vmem>>, vector<2x32x256xf32>
    tpu.vector_store %arg4[%c0_12, %c0_13, %c0_14], %22 {strides = array<i32>} : memref<2x32x256xf32, #tpu.memory_space<vmem>>, vector<2x32x256xf32>,
    return
  }
  func.func @transform_0(%arg0: i32) -> (i32, i32, i32) {
    %c0_i32 = arith.constant 0 : i32
    %c0_i32_0 = arith.constant 0 : i32
    %c0_i32_1 = arith.constant 0 : i32
    return %arg0, %c0_i32, %c0_i32_0 : i32, i32, i32
  }
  func.func @transform_1(%arg0: i32) -> (i32, i32) {
    %c0_i32 = arith.constant 0 : i32
    %c0_i32_0 = arith.constant 0 : i32
    %c0_i32_1 = arith.constant 0 : i32
    return %c0_i32, %c0_i32_0 : i32, i32
  }
  func.func @transform_2(%arg0: i32) -> (i32, i32) {
    %c0_i32 = arith.constant 0 : i32
    %c0_i32_0 = arith.constant 0 : i32
    %c0_i32_1 = arith.constant 0 : i32
    return %c0_i32, %c0_i32_0 : i32, i32
  }
  func.func @transform_3(%arg0: i32) -> (i32, i32, i32) {
    %c0_i32 = arith.constant 0 : i32
    %c0_i32_0 = arith.constant 0 : i32
    %c0_i32_1 = arith.constant 0 : i32
    return %arg0, %c0_i32, %c0_i32_0 : i32, i32, i32
  }
}

</mosaic_0001>

<bundles_post_ra>
// kernel: tpu_custom_call.1
= control target key start
LH: loop header
LB: loop body
LE: loop exit
PB: predicated region body
PF: predicated region fallthrough
CT: control target
= control target key end

     0   :  { %8 = vsyncpa [#allocation3], 0  ;;  %s729_s0 = inlined_call_operand.hbm [shape: f32[2,32,256], index: 0, kind: input, shape index: {}]   ;;  %s730_s1 = inlined_call_operand.vmem [shape: f32[32,2], index: 1, kind: input, shape index: {}]   ;;  %s731_s2 = inlined_call_operand.vmem [shape: f32[2,32], index: 2, kind: input, shape index: {}]   ;;  %s732_s3 = inlined_call_operand.hbm [shape: f32[2,32,256], index: 3, kind: output, shape index: {}]  }
   0x1   :  { %9 = vsyncpa [#allocation4], 0  ;;  %s555_s12 = smov [#allocation2]   ;;  %s507_s16 = scalar_lea.hbm %s729_s0, 2048 }
   0x2   :  { %s15_s13 = sshll.u32 %s555_s12, 4  ;;  %p508_p0 = scmp.ne.s32.totalorder %s729_s0, %s507_s16  ;;  %s16_s13 = int_to_ptr.vmem [resolvable:$true] %s15_s13 }
   0x3   :  { %p511_p1 = scmp.lt.u32.totalorder %s507_s16, %s729_s0 }
   0x5   :  { %p513_p2 = pnand %p511_p1, %p508_p0 }
   0x7   :  { %516 = shalt.err (!%p513_p2)
}
   0x8   :  { %s517_s21 = scalar_lea.vmem %s16_s13, 2048  ;;  %p522_p4 = scmp.lt.s32.totalorder %s16_s13, %s16_s13 }
   0x9   :  { %p518_p3 = scmp.ne.s32.totalorder %s16_s13, %s517_s21  ;;  %p523_p5 = scmp.lt.s32.totalorder %s517_s21, %s517_s21 }
   0xb   :  { %p524_p6 = por %p523_p5, %p522_p4 }
   0xd   :  { %p525_p7 = pnand %p524_p6, %p518_p3 }
   0xf   :  { %528 = shalt.err (!%p525_p7)
}
  0x10   :  { %s556_s22 = smov 256   ;;  %s557_s23 = smov 16  }
  0x11   :  { %21 = dma.hbm_to_vmem [thread:$0]  %s729_s0, 2048, %s16_s13, [#allocation3], %s556_s22, %s556_s22, %s557_s23  }
  0x12   :  { %551 = dma.done.wait [#allocation3], 2048  }
  0x13   :  { %552 = vsyncadd [#allocation3], 4294965248  ;;  %v597_v0 = vld [vmem:[#allocation2 + $0x40] sm:$0xff]  ;;  %v599_v1 = vld [vmem:[#allocation2 + $0x48] sm:$0xff]  ;;  %v558_v35 = vmov 0.0|0.0   ;;  %vm559_vm0 = vmmov 0   ;;  %v109_v45 = vlaneseq }
  0x14   :  { %v601_v2 = vld [vmem:[#allocation2] sm:$0xff]  ;;  %v57_v3 = vadd.f32 %v599_v1, %v597_v0  ;;  %v605_v4 = vld [vmem:[#allocation2 + $0x8] sm:$0xff]  ;;  %v607_v5 = vld [vmem:[#allocation2 + $0x50] sm:$0xff]  ;;  %v89_v27 = vmax.f32 %v597_v0, %v599_v1  ;;  %490 = vmatprep.subr.bf16.mxu0 %v558_v35  ;;  %v560_v39 = vmov 0.0   ;;  %vm120_vm1 = vcmask 130112  }
  0x15   :  { %v609_v6 = vld [vmem:[#allocation2 + $0x58] sm:$0xff]  ;;  %v45_v7 = vadd.f32 %v605_v4, %v601_v2  ;;  %v613_v8 = vld [vmem:[#allocation2 + $0x10] sm:$0xff]  ;;  %v621_v12 = vld [vmem:[#allocation2 + $0x60] sm:$0xff]  ;;  %v77_v25 = vmax.f32 %v601_v2, %v605_v4  ;;  %482 = vmatprep.mubr.msk.f32.mxu0 %vm559_vm0, %v560_v39  ;;  %485 = vmatprep.subr.mxu1 %v560_v39  ;;  %v110_v48 = vand.u32 127, %v109_v45  ;;  %v673_v50 = vshrl.u32 %v109_v45, 7 }
  0x16   :  { %v615_v9 = vld [vmem:[#allocation2 + $0x18] sm:$0xff]  ;;  %58 = vadd.xlane.f32.xlu1 %v57_v3  ;;  %v60_v10 = vadd.f32 %v609_v6, %v607_v5  ;;  %v623_v13 = vld [vmem:[#allocation2 + $0x68] sm:$0xff]  ;;  %v625_v14 = vld [vmem:[#allocation2 + $0x20] sm:$0xff]  ;;  %v92_v26 = vmax.f32 %v607_v5, %v609_v6  ;;  %487 = vmatprep.mubr.msk.f32.mxu1 %vm559_vm0, %v560_v39  ;;  %vm127_vm2 = vcmask 195712   ;;  %vm134_vm3 = vcmask 261312  }
  0x17   :  { %46 = vadd.xlane.f32.xlu0 %v45_v7  ;;  %v48_v11 = vadd.f32 %v615_v9, %v613_v8  ;;  %v627_v15 = vld [vmem:[#allocation2 + $0x28] sm:$0xff]  ;;  %v63_v16 = vadd.f32 %v623_v13, %v621_v12  ;;  %v633_v18 = vld [vmem:[#allocation2 + $0x70] sm:$0xff]  ;;  %v635_v19 = vld [vmem:[#allocation2 + $0x78] sm:$0xff]  ;;  %v80_v24 = vmax.f32 %v613_v8, %v615_v9  ;;  %v95_v28 = vmax.f32 %v621_v12, %v623_v13 }
  0x18   :  { %v51_v17 = vadd.f32 %v627_v15, %v625_v14  ;;  %v637_v20 = vld [vmem:[#allocation2 + $0x30] sm:$0xff]  ;;  %v639_v21 = vld [vmem:[#allocation2 + $0x38] sm:$0xff]  ;;  %v66_v22 = vadd.f32 %v635_v19, %v633_v18  ;;  %v83_v29 = vmax.f32 %v625_v14, %v627_v15  ;;  %v98_v30 = vmax.f32 %v633_v18, %v635_v19  ;;  %v209_v32 = vld [vmem:[%s730_s1] sm:$0xff] }
  0x19   :  { %v54_v23 = vadd.f32 %v639_v21, %v637_v20  ;;  %v86_v31 = vmax.f32 %v637_v20, %v639_v21  ;;  %v210_v33 = vld [vmem:[%s730_s1 + $0x8] sm:$0xff]  ;;  %v211_v36 = vld [vmem:[%s730_s1 + $0x10] sm:$0xff]  ;;  %v212_v37 = vld [vmem:[%s730_s1 + $0x18] sm:$0xff]  ;;  %v115_v51 = vadd.s32 4294967288, %v110_v48  ;;  %v122_v52 = vadd.s32 4294967280, %v110_v48 }
  0x1a   :  { %61 = vadd.xlane.f32.xlu1 %v60_v10  ;;  %v491_v34 = vpack.c.bf16 %v210_v33, %v209_v32  ;;  %v494_v38 = vpack.c.bf16 %v212_v37, %v211_v36  ;;  %v129_v54 = vadd.s32 4294967272, %v110_v48  ;;  %v113_v56 = vsub.s32 %v110_v48, %v673_v50 }
  0x1b   :  { %49 = vadd.xlane.f32.xlu0 %v48_v11  ;;  %v118_v57 = vsub.s32 %v115_v51, %v673_v50  ;;  %v125_v59 = vsub.s32 %v122_v52, %v673_v50  ;;  %vm155_vm4 = vcmask 1041409   ;;  %vm204_vm5 = vcmask 1043459  }
  0x1c   :  { %492 = vmatpush3.bf16.msra.mxu0 %v491_v34  ;;  %v132_v10 = vsub.s32 %v129_v54, %v673_v50  ;;  %vm207_vm6 = vcmask 1041408   ;;  %vm213_vm7 = vcmask 261120   ;;  %vm289_vm8 = vcmask 15360  }
  0x1d   :  { %493 = vmatprep.subr.bf16.mxu0 %v558_v35 }
  0x1e   :  { %64 = vadd.xlane.f32.xlu1 %v63_v16 }
  0x1f   :  { %52 = vadd.xlane.f32.xlu0 %v51_v17 }
  0x20   :  { %495 = vmatpush3.bf16.msra.mxu0 %v494_v38 }
  0x22   :  { %67 = vadd.xlane.f32.xlu1 %v66_v22 }
  0x23   :  { %55 = vadd.xlane.f32.xlu0 %v54_v23 }
  0x26   :  { %81 = vmax.xlane.f32.xlu1 %v80_v24 }
  0x27   :  { %78 = vmax.xlane.f32.xlu0 %v77_v25 }
  0x2a   :  { %93 = vmax.xlane.f32.xlu1 %v92_v26 }
  0x2b   :  { %90 = vmax.xlane.f32.xlu0 %v89_v27 }
  0x2e   :  { %96 = vmax.xlane.f32.xlu1 %v95_v28 }
  0x2f   :  { %84 = vmax.xlane.f32.xlu0 %v83_v29 }
  0x32   :  { %99 = vmax.xlane.f32.xlu1 %v98_v30 }
  0x33   :  { %87 = vmax.xlane.f32.xlu0 %v86_v31 }
  0xa3   :  { %v59_v40 = vpop.xlane.xlu1 %58 }
  0xa4   :  { %v47_v41 = vpop.xlane.xlu0 %46  ;;  %v73_v60 = vmul.f32 0.00390625, %v59_v40 }
  0xa5   :  { %v69_v61 = vmul.f32 0.00390625, %v47_v41 }
  0xa6   :  { %v139_v23 = vrot.slane %v73_v60, %v113_v56 }
  0xa7   :  { %v62_v42 = vpop.xlane.xlu1 %61  ;;  %v114_v24 = vrot.slane %v69_v61, %v113_v56 }
  0xa8   :  { %v50_v43 = vpop.xlane.xlu0 %49  ;;  %v74_v58 = vmul.f32 0.00390625, %v62_v42 }
  0xa9   :  { %v70_v62 = vmul.f32 0.00390625, %v50_v43 }
  0xaa   :  { %v143_v22 = vrot.slane %v74_v58, %v118_v57  ;;  %v288_v58 = vld [vmem:[%s731_s2] sm:$0x3]  ;;  %s561_s2 = smov [#allocation5]  }
  0xab   :  { %v65_v44 = vpop.xlane.xlu1 %64  ;;  %v119_v25 = vrot.slane %v70_v62, %v118_v57  ;;  %486 = vmatpush3.msk.msra.mxu1 %vm207_vm6, %v288_v58  ;;  %s451_s7 = sshll.u32 %s561_s2, 4  ;;  %s452_s7 = int_to_ptr.vmem [resolvable:$true] %s451_s7 }
  0xac   :  { %v53_v46 = vpop.xlane.xlu0 %52  ;;  %v75_v63 = vmul.f32 0.00390625, %v65_v44  ;;  %v144_v37 = vsel %vm120_vm1, %v143_v22, %v139_v23  ;;  %s529_s8 = scalar_lea.vmem %s452_s7, 2048  ;;  %p534_p9 = scmp.lt.s32.totalorder %s452_s7, %s452_s7 }
  0xad   :  { %v71_v7 = vmul.f32 0.00390625, %v53_v46  ;;  %v121_v39 = vsel %vm120_vm1, %v119_v25, %v114_v24  ;;  %v397_v24 = vsub.s32 1, %v673_v50  ;;  %p530_p8 = scmp.ne.s32.totalorder %s452_s7, %s529_s8  ;;  %p535_p10 = scmp.lt.s32.totalorder %s529_s8, %s529_s8 }
  0xae   :  { %v148_v26 = vrot.slane %v75_v63, %v125_v59 }
  0xaf   :  { %v68_v47 = vpop.xlane.xlu1 %67  ;;  %v126_v28 = vrot.slane %v71_v7, %v125_v59  ;;  %p536_p11 = por %p535_p10, %p534_p9 }
  0xb0   :  { %v56_v49 = vpop.xlane.xlu0 %55  ;;  %v76_v11 = vmul.f32 0.00390625, %v68_v47  ;;  %v149_v40 = vsel %vm127_vm2, %v148_v26, %v144_v37 }
  0xb1   :  { %v72_v17 = vmul.f32 0.00390625, %v56_v49  ;;  %v128_v42 = vsel %vm127_vm2, %v126_v28, %v121_v39  ;;  %p537_p12 = pnand %p536_p11, %p530_p8 }
  0xb2   :  { %v153_v29 = vrot.slane %v76_v11, %v132_v10 }
  0xb3   :  { %v82_v53 = vpop.xlane.xlu1 %81  ;;  %v133_v33 = vrot.slane %v72_v17, %v132_v10  ;;  %v378_v17 = vsub.s32 0, %v673_v50 }
  0xb4   :  { %v79_v55 = vpop.xlane.xlu0 %78  ;;  %v173_v34 = vrot.slane %v82_v53, %v118_v57  ;;  %v154_v43 = vsel %vm134_vm3, %v153_v29, %v149_v40 }
  0xb5   :  { %v169_v35 = vrot.slane %v79_v55, %v113_v56  ;;  %v135_v47 = vsel %vm134_vm3, %v133_v33, %v128_v42 }
  0xb6   :  { %v156_v55 = vsel %vm155_vm4, %v154_v43, %v135_v47 }
  0xb7   :  { %v94_v3 = vpop.xlane.xlu1 %93  ;;  %v174_v48 = vsel %vm120_vm1, %v173_v34, %v169_v35 }
  0xb8   :  { %v91_v16 = vpop.xlane.xlu0 %90  ;;  %v192_v30 = vrot.slane %v94_v3, %v118_v57 }
  0xb9   :  { %v188_v31 = vrot.slane %v91_v16, %v113_v56 }
  0xbb   :  { %v97_v27 = vpop.xlane.xlu1 %96  ;;  %v193_v44 = vsel %vm120_vm1, %v192_v30, %v188_v31 }
  0xbc   :  { %v85_v32 = vpop.xlane.xlu0 %84  ;;  %v197_v36 = vrot.slane %v97_v27, %v125_v59 }
  0xbd   :  { %v178_v38 = vrot.slane %v85_v32, %v125_v59 }
  0xbe   :  { %v198_v49 = vsel %vm127_vm2, %v197_v36, %v193_v44 }
  0xbf   :  { %v100_v41 = vpop.xlane.xlu1 %99  ;;  %v179_v52 = vsel %vm127_vm2, %v178_v38, %v174_v48 }
  0xc0   :  { %v202_v45 = vrot.slane %v100_v41, %v132_v10  ;;  %v88_v46 = vpop.xlane.xlu0 %87 }
  0xc1   :  { %v183_v51 = vrot.slane %v88_v46, %v132_v10 }
  0xc2   :  { %v203_v53 = vsel %vm134_vm3, %v202_v45, %v198_v49 }
  0xc3   :  { %v184_v54 = vsel %vm134_vm3, %v183_v51, %v179_v52 }
  0xc4   :  { %v205_v56 = vsel %vm204_vm5, %v203_v53, %v184_v54 }
  0xc5   :  { %v208_v57 = vsel %vm207_vm6, %v156_v55, %v205_v56 }
  0xc6   :  { %483 = vmatmul.mubr.msk.f32.vlgmr.msra.gmra.mrb[0].mxu0 %vm213_vm7, %v208_v57 }
 0x199   :  { %v283_v59 = vpop.f32.mrb[0].mxu0 }
 0x19a   :  { %v287_v60 = vmax.f32 %v283_v59, 0.0  ;;  %v484_v61 = vpop.f32.mrb[1].mxu0 }
 0x19c   :  { %488 = vmatmul.mubr.msk.f32.vlgmr.msra.gmra.mrb[0].mxu1 %vm289_vm8, %v287_v60 }
 0x26f   :  { %v362_v62 = vpop.f32.mrb[0].mxu1 }
 0x270   :  { %v367_v63 = vrot.slane %v362_v62, 2  ;;  %v489_v3 = vpop.f32.mrb[1].mxu1 }
 0x272   :  { %v369_v7 = vadd.f32 %v367_v63, %v362_v62 }
 0x274   :  { %v466_v10 = vmul.f32 -1.442695, %v369_v7 }
 0x276   :  { %503 = vpow2.f32 %v466_v10 }
 0x280   :  { %v504_v11 = vpop.eup %503 }
 0x281   :  { %v373_v16 = vadd.f32 1.0, %v504_v11 }
 0x283   :  { %505 = vrcp.f32 %v373_v16 }
 0x28d   :  { %v506_v22 = vpop.eup %505 }
 0x28e   :  { %v379_v23 = vrot.slane %v506_v22, %v378_v17  ;;  %v398_v25 = vrot.slane %v506_v22, %v397_v24 }
 0x290   :  { %385 = vbcast.lane.b32.xlu1 %v379_v23, 264  ;;  %381 = vbcast.lane.b32.xlu0 %v379_v23, 256 }
 0x294   :  { %389 = vbcast.lane.b32.xlu1 %v379_v23, 272  ;;  %400 = vbcast.lane.b32.xlu0 %v398_v25, 256 }
 0x298   :  { %393 = vbcast.lane.b32.xlu1 %v379_v23, 280  ;;  %408 = vbcast.lane.b32.xlu0 %v398_v25, 272 }
 0x29c   :  { %404 = vbcast.lane.b32.xlu1 %v398_v25, 264 }
 0x2a0   :  { %412 = vbcast.lane.b32.xlu1 %v398_v25, 280 }
 0x302   :  { %v386_v26 = vpop.permute.xlu1 %385  ;;  %v382_v27 = vpop.permute.xlu0 %381 }
 0x303   :  { %v416_v28 = vmul.f32 %v386_v26, %v613_v8  ;;  %v417_v29 = vmul.f32 %v386_v26, %v615_v9  ;;  %v414_v30 = vmul.f32 %v382_v27, %v601_v2  ;;  %v415_v31 = vmul.f32 %v382_v27, %v605_v4 }
 0x305   :  { %432 = vst [vmem:[#allocation5 + $0x10] sm:$0xff] %v416_v28  ;;  %433 = vst [vmem:[#allocation5 + $0x18] sm:$0xff] %v417_v29 }
 0x306   :  { %430 = vst [vmem:[#allocation5] sm:$0xff] %v414_v30  ;;  %431 = vst [vmem:[#allocation5 + $0x8] sm:$0xff] %v415_v31  ;;  %v390_v50 = vpop.permute.xlu1 %389  ;;  %v401_v32 = vpop.permute.xlu0 %400 }
 0x307   :  { %v418_v33 = vmul.f32 %v390_v50, %v625_v14  ;;  %v419_v34 = vmul.f32 %v390_v50, %v627_v15  ;;  %v422_v35 = vmul.f32 %v401_v32, %v597_v0  ;;  %v423_v8 = vmul.f32 %v401_v32, %v599_v1 }
 0x309   :  { %434 = vst [vmem:[#allocation5 + $0x20] sm:$0xff] %v418_v33  ;;  %435 = vst [vmem:[#allocation5 + $0x28] sm:$0xff] %v419_v34 }
 0x30a   :  { %438 = vst [vmem:[#allocation5 + $0x40] sm:$0xff] %v422_v35  ;;  %439 = vst [vmem:[#allocation5 + $0x48] sm:$0xff] %v423_v8  ;;  %v394_v2 = vpop.permute.xlu1 %393  ;;  %v409_v4 = vpop.permute.xlu0 %408 }
 0x30b   :  { %v420_v9 = vmul.f32 %v394_v2, %v637_v20  ;;  %v421_v36 = vmul.f32 %v394_v2, %v639_v21  ;;  %v426_v37 = vmul.f32 %v409_v4, %v621_v12  ;;  %v427_v14 = vmul.f32 %v409_v4, %v623_v13 }
 0x30d   :  { %436 = vst [vmem:[#allocation5 + $0x30] sm:$0xff] %v420_v9  ;;  %437 = vst [vmem:[#allocation5 + $0x38] sm:$0xff] %v421_v36 }
 0x30e   :  { %442 = vst [vmem:[#allocation5 + $0x60] sm:$0xff] %v426_v37  ;;  %443 = vst [vmem:[#allocation5 + $0x68] sm:$0xff] %v427_v14  ;;  %v405_v0 = vpop.permute.xlu1 %404 }
 0x30f   :  { %v424_v1 = vmul.f32 %v405_v0, %v607_v5  ;;  %v425_v15 = vmul.f32 %v405_v0, %v609_v6 }
 0x311   :  { %440 = vst [vmem:[#allocation5 + $0x50] sm:$0xff] %v424_v1  ;;  %441 = vst [vmem:[#allocation5 + $0x58] sm:$0xff] %v425_v15 }
 0x312   :  { %v413_v20 = vpop.permute.xlu1 %412 }
 0x313   :  { %v428_v21 = vmul.f32 %v413_v20, %v633_v18  ;;  %v429_v12 = vmul.f32 %v413_v20, %v635_v19 }
 0x315   :  { %444 = vst [vmem:[#allocation5 + $0x70] sm:$0xff] %v428_v21  ;;  %445 = vst [vmem:[#allocation5 + $0x78] sm:$0xff] %v429_v12 }
 0x316   :  { %540 = shalt.err (!%p537_p12)
}
 0x317   :  { %s541_s11 = scalar_lea.hbm %s732_s3, 2048 }
 0x318   :  { %p542_p13 = scmp.ne.s32.totalorder %s732_s3, %s541_s11  ;;  %p545_p0 = scmp.lt.u32.totalorder %s541_s11, %s732_s3 }
 0x31a   :  { %p547_p1 = pnand %p545_p0, %p542_p13 }
 0x31c   :  { %550 = shalt.err (!%p547_p1)
}
 0x31d   :  { %457 = dma.vmem_to_hbm [thread:$0]  %s452_s7, 2048, %s732_s3, [#allocation4], %s556_s22, %s556_s22, %s557_s23  }
 0x31e   :  { %553 = dma.done.wait [#allocation4], 2048  }
 0x31f   :  { %554 = vsyncadd [#allocation4], 4294965248 }
 0x320   :  { %461 = vsyncpa [#allocation3], 1 }
 0x321   :  { %462 = vsyncpa [#allocation4], 1 }

</bundles_post_ra>
